<compile_context>
chip_gen: v5e
topology: v5e:2x2
jax: 0.10.0
libtpu: 0.0.40
codegen_flags: <defaults>
</compile_context>

<pallas_src>
import jax
import jax.numpy as jnp
import numpy as np
from jax.experimental import pallas as pl
from jax.experimental.pallas import tpu as pltpu


def _make_indexing_kernel(salient_channels):
    sc = tuple(int(c) for c in salient_channels)

    def kernel(x_ref, o_ref):
        # x_ref: VMEM (C, chunk) slab of the input (batch dim squeezed).
        # o_ref: VMEM (final_size, chunk) slab of the output.
        # Zero the whole output slab once, then statically-unrolled row copies
        # place each input channel at its salient position.
        o_ref[...] = jnp.zeros_like(o_ref)
        for i, ch in enumerate(sc):
            o_ref[ch:ch + 1, :] = x_ref[i:i + 1, :]

    return kernel


def _pick_spatial_chunk(hw, c, final_size, itemsize, budget_bytes):
    """Largest lane-dense (multiple of 128) divisor of hw whose double-buffered
    in+out slabs fit the VMEM budget. Falls back to full extent if hw is not a
    multiple of 128 (full-dim blocks are always legal)."""
    if hw % 128 != 0:
        return hw
    n = hw // 128
    per_col_bytes = (c + final_size) * itemsize * 2  # double-buffered input + output
    best = 128
    for d in range(1, n + 1):
        if n % d == 0 and (d * 128) * per_col_bytes <= budget_bytes:
            best = d * 128
    return best


def indexing_layer(x, salient_channels, final_size, *, vmem_budget_bytes=12 * 1024 * 1024):
    """x: (B, C, H, W) with C == len(salient_channels). Returns (B, final_size, H, W)."""
    B, C, H, W = x.shape
    sc = [int(c) for c in salient_channels]
    assert C == len(sc)
    assert len(set(sc)) == len(sc), "salient_channels must be unique"
    assert all(0 <= c < final_size for c in sc), "salient_channels must be < final_size"

    HW = H * W
    x2 = x.reshape(B, C, HW)  # lane-dense layout: last dim is H*W (multiple of 128 here)

    itemsize = jnp.dtype(x.dtype).itemsize
    chunk = _pick_spatial_chunk(HW, C, final_size, itemsize, vmem_budget_bytes)
    n_chunks = HW // chunk

    out2 = pl.pallas_call(
        _make_indexing_kernel(sc),
        out_shape=jax.ShapeDtypeStruct((B, final_size, HW), x.dtype),
        grid=(B, n_chunks),
        in_specs=[
            # Whole-channel input slab per (batch, spatial-chunk) step; batch dim squeezed.
            pl.BlockSpec((None, C, chunk), lambda b, s: (b, 0, s)),
        ],
        out_specs=pl.BlockSpec((None, final_size, chunk), lambda b, s: (b, 0, s)),
        compiler_params=pltpu.CompilerParams(
            # Both axes are independent -> shardable across TensorCores (v7x megacore).
            dimension_semantics=("parallel", "parallel"),
            vmem_limit_bytes=32 * 1024 * 1024,
        ),
    )(x2)

    return out2.reshape(B, final_size, H, W)


if __name__ == "__main__":
    # Small shapes consistent with the module's forward.
    B, C, H, W = 2, 4, 16, 16
    final_size = 8
    salient_channels = [5, 1, 6, 3]  # len == C, unique, values < final_size

    key = jax.random.PRNGKey(0)
    x = jax.random.normal(key, (B, C, H, W), dtype=jnp.float32)

    out = indexing_layer(x, salient_channels, final_size)
    out = jax.block_until_ready(out)

    # Pure-JAX reference (zero template + scatter into salient channels).
    ref = jnp.zeros((B, final_size, H, W), dtype=x.dtype)
    ref = ref.at[:, jnp.asarray(salient_channels)].set(x)
    np.testing.assert_allclose(np.asarray(out), np.asarray(ref), rtol=0, atol=0)

    print("KERNEL_OK")
</pallas_src>

<mosaic_0001>
module attributes {stable_mosaic.version = 11 : i64} {
  func.func @kernel(%arg0: i32, %arg1: i32, %arg2: memref<1x4x256xf32, #tpu.memory_space<vmem>>, %arg3: memref<1x8x256xf32, #tpu.memory_space<vmem>>) attributes {dimension_semantics = [#tpu.dimension_semantics<parallel>, #tpu.dimension_semantics<parallel>], iteration_bounds = array<i64: 2, 1>, scalar_prefetch = 0 : i64, scratch_operands = 0 : i64, tpu.core_type = #tpu.core_type<tc>, window_params = [{transform_indices = @transform_0, window_bounds = array<i64: 1, 4, 256>}, {transform_indices = @transform_1, window_bounds = array<i64: 1, 8, 256>}]} {
    %cst = arith.constant 0.000000e+00 : f32
    %0 = vector.broadcast %cst : f32 to vector<8x256xf32>
    %c0 = arith.constant 0 : index
    %c0_0 = arith.constant 0 : index
    %c0_1 = arith.constant 0 : index
    %1 = vector.load %arg3[%c0, %c0_0, %c0_1] : memref<1x8x256xf32, #tpu.memory_space<vmem>>, vector<1x8x256xf32>
    %2 = vector.shape_cast %1 : vector<1x8x256xf32> to vector<8x256xf32>
    %3 = vector.shape_cast %0 : vector<8x256xf32> to vector<1x8x256xf32>
    tpu.vector_store %arg3[%c0, %c0_0, %c0_1], %3 {strides = array<i32>} : memref<1x8x256xf32, #tpu.memory_space<vmem>>, vector<1x8x256xf32>,
    %c0_2 = arith.constant 0 : index
    %c0_3 = arith.constant 0 : index
    %c0_4 = arith.constant 0 : index
    %4 = vector.load %arg2[%c0_2, %c0_3, %c0_4] : memref<1x4x256xf32, #tpu.memory_space<vmem>>, vector<1x1x256xf32>
    %5 = vector.shape_cast %4 : vector<1x1x256xf32> to vector<1x256xf32>
    %c0_5 = arith.constant 0 : index
    %c5 = arith.constant 5 : index
    %c0_6 = arith.constant 0 : index
    %6 = vector.load %arg3[%c0_5, %c5, %c0_6] : memref<1x8x256xf32, #tpu.memory_space<vmem>>, vector<1x1x256xf32>
    %7 = vector.shape_cast %6 : vector<1x1x256xf32> to vector<1x256xf32>
    %8 = vector.shape_cast %5 : vector<1x256xf32> to vector<1x1x256xf32>
    tpu.vector_store %arg3[%c0_5, %c5, %c0_6], %8 {strides = array<i32>} : memref<1x8x256xf32, #tpu.memory_space<vmem>>, vector<1x1x256xf32>,
    %c0_7 = arith.constant 0 : index
    %c1 = arith.constant 1 : index
    %c0_8 = arith.constant 0 : index
    %9 = vector.load %arg2[%c0_7, %c1, %c0_8] : memref<1x4x256xf32, #tpu.memory_space<vmem>>, vector<1x1x256xf32>
    %10 = vector.shape_cast %9 : vector<1x1x256xf32> to vector<1x256xf32>
    %c0_9 = arith.constant 0 : index
    %c1_10 = arith.constant 1 : index
    %c0_11 = arith.constant 0 : index
    %11 = vector.load %arg3[%c0_9, %c1_10, %c0_11] : memref<1x8x256xf32, #tpu.memory_space<vmem>>, vector<1x1x256xf32>
    %12 = vector.shape_cast %11 : vector<1x1x256xf32> to vector<1x256xf32>
    %13 = vector.shape_cast %10 : vector<1x256xf32> to vector<1x1x256xf32>
    tpu.vector_store %arg3[%c0_9, %c1_10, %c0_11], %13 {strides = array<i32>} : memref<1x8x256xf32, #tpu.memory_space<vmem>>, vector<1x1x256xf32>,
    %c0_12 = arith.constant 0 : index
    %c2 = arith.constant 2 : index
    %c0_13 = arith.constant 0 : index
    %14 = vector.load %arg2[%c0_12, %c2, %c0_13] : memref<1x4x256xf32, #tpu.memory_space<vmem>>, vector<1x1x256xf32>
    %15 = vector.shape_cast %14 : vector<1x1x256xf32> to vector<1x256xf32>
    %c0_14 = arith.constant 0 : index
    %c6 = arith.constant 6 : index
    %c0_15 = arith.constant 0 : index
    %16 = vector.load %arg3[%c0_14, %c6, %c0_15] : memref<1x8x256xf32, #tpu.memory_space<vmem>>, vector<1x1x256xf32>
    %17 = vector.shape_cast %16 : vector<1x1x256xf32> to vector<1x256xf32>
    %18 = vector.shape_cast %15 : vector<1x256xf32> to vector<1x1x256xf32>
    tpu.vector_store %arg3[%c0_14, %c6, %c0_15], %18 {strides = array<i32>} : memref<1x8x256xf32, #tpu.memory_space<vmem>>, vector<1x1x256xf32>,
    %c0_16 = arith.constant 0 : index
    %c3 = arith.constant 3 : index
    %c0_17 = arith.constant 0 : index
    %19 = vector.load %arg2[%c0_16, %c3, %c0_17] : memref<1x4x256xf32, #tpu.memory_space<vmem>>, vector<1x1x256xf32>
    %20 = vector.shape_cast %19 : vector<1x1x256xf32> to vector<1x256xf32>
    %c0_18 = arith.constant 0 : index
    %c3_19 = arith.constant 3 : index
    %c0_20 = arith.constant 0 : index
    %21 = vector.load %arg3[%c0_18, %c3_19, %c0_20] : memref<1x8x256xf32, #tpu.memory_space<vmem>>, vector<1x1x256xf32>
    %22 = vector.shape_cast %21 : vector<1x1x256xf32> to vector<1x256xf32>
    %23 = vector.shape_cast %20 : vector<1x256xf32> to vector<1x1x256xf32>
    tpu.vector_store %arg3[%c0_18, %c3_19, %c0_20], %23 {strides = array<i32>} : memref<1x8x256xf32, #tpu.memory_space<vmem>>, vector<1x1x256xf32>,
    return
  }
  func.func @transform_0(%arg0: i32, %arg1: i32) -> (i32, i32, i32) {
    %c0_i32 = arith.constant 0 : i32
    %c0_i32_0 = arith.constant 0 : i32
    return %arg0, %c0_i32, %arg1 : i32, i32, i32
  }
  func.func @transform_1(%arg0: i32, %arg1: i32) -> (i32, i32, i32) {
    %c0_i32 = arith.constant 0 : i32
    %c0_i32_0 = arith.constant 0 : i32
    return %arg0, %c0_i32, %arg1 : i32, i32, i32
  }
}

</mosaic_0001>

<bundles_post_ra>
// kernel: tpu_custom_call.1
= control target key start
LH: loop header
LB: loop body
LE: loop exit
PB: predicated region body
PF: predicated region fallthrough
CT: control target
= control target key end

     0   :  { %6 = vsyncpa [#allocation3], 0  ;;  %s616_s0 = inlined_call_operand.hbm [shape: f32[2,4,256], index: 0, kind: input, shape index: {}]   ;;  %s617_s1 = inlined_call_operand.hbm [shape: f32[2,8,256], index: 1, kind: output, shape index: {}]  }
   0x1   :  { %8 = vsyncpa [#allocation3 + $0x1], 0 }
   0x2   :  { %9 = vsyncpa [#allocation4], 0 }
   0x3   :  { %11 = vsyncpa [#allocation4 + $0x1], 0  ;;  %s495_s6 = smov 0   ;;  %s497_s7 = smov 0  }
   0x4   :  { %s499_s8 = smov 0   ;;  %s501_s9 = smov 0  }
   0x5   :  { %s503_s10 = smov 0   ;;  %s505_s11 = smov 0  }
   0x6 LB: > { %s283_s12 = sadd.s32 4294967295, %s482_s11   ;;  %s284_s13 = sadd.s32 4294967294, %s482_s11   ;;  %s482_s11 = sphi %s505_s11, %s17_s11   ;;  %s478_s10 = sphi %s503_s10, %s626_s10   ;;  %s474_s9 = sphi %s501_s9, %s625_s9   ;;  %s470_s8 = sphi %s499_s8, %s624_s8   ;;  %s466_s7 = sphi %s497_s7, %s623_s7   ;;  %s462_s6 = sphi %s495_s6, %s622_s6  }
   0x7   : > { %s29_s14 = sadd.s32 1, %s478_s10  ;;  %s38_s15 = sadd.s32 1, %s470_s8 }
   0x8   : > { %p31_p0 = scmp.ge.s32.totalorder %s29_s14, 2  ;;  %p45_p1 = scmp.ne.s32.totalorder %s470_s8, %s466_s7 }
   0x9   : > { %p46_p2 = scmp.eq.s32.totalorder %s482_s11, 0  ;;  %p51_p3 = scmp.ne.s32.totalorder %s466_s7, %s462_s6 }
   0xa   : > { %s628_s14 = smov (%p31_p0, %s29_s14), 0  ;;  %p52_p5 = scmp.eq.s32.totalorder %s283_s12, 0 }
   0xb   : > { %p536_p4 = por %p46_p2, %p45_p1  ;;  %s33_s17 = ssub.s32 %s478_s10, %s628_s14 }
   0xc   : > { %p77_p6 = scmp.eq.s32.totalorder %s283_s12, 1  ;;  %p36_p7 = scmp.eq.s32.totalorder %s33_s17, 0 }
   0xd   : > { %p542_p8 = por %p52_p5, %p51_p3  ;;  %p83_p10 = scmp.eq.s32.totalorder %s284_s13, 1 }
   0xe   : > { %p546_p9 = por %p77_p6, %p45_p1  ;;  %p286_p12 = scmp.ge.s32.totalorder %s482_s11, 2 }
   0xf   : > { %s551_s20 = scalar_select %p36_p7, %s470_s8, %s38_s15  }
  0x10   : > { %p553_p11 = por %p83_p10, %p51_p3  ;;  %p319_p13 = scmp.lt.s32.totalorder %s482_s11, 2 }
  0x11   : > { %s103_s22 = sand.u32 1, %s470_s8   ;;  %s305_s24 = sshll.u32 %s478_s10, 3 }
  0x12   : > { %s287_s23 = sshll.u32 %s103_s22, 3  ;;  %s114_s27 = scalar_lea.hbm %s616_s0, %s305_s24 }
  0x13   : > { %s107_s28 = scalar_lea.vmem [#allocation2], %s287_s23  ;;  %s116_s30 = sshll.u32 %s114_s27, 4  ;;  %s117_s30 = int_to_ptr.hbm [resolvable:$true] %s116_s30 }
  0x14   : > { %s118_s29 = sshll.u32 %s107_s28, 4  ;;  %p312_p0 = pnand %p319_p13, %p536_p4  ;;  %s119_s29 = int_to_ptr.vmem [resolvable:$true] %s118_s29 }
  0x15   : > { %p290_p1 = scmp.ge.s32.totalorder %s482_s11, 1  ;;  %p123_p2 = scmp.lt.s32.totalorder %s482_s11, 3 }
  0x16   : > { %s104_s2 = scalar_lea.sflag [#allocation3], %s103_s22 }
  0x17   : > { %314 = dma.hbm_to_vmem [thread:$0]  (!%p312_p0), %s117_s30, 128, %s119_s29, %s104_s2  }
  0x18   : > { %p124_p3 = pnand %p290_p1, %p123_p2 }
  0x19   : > { %s569_s3 = sand.u32 (!%p124_p3), 1, %s466_s7  }
  0x1a   : > { %127 = sbr.rel (%p124_p3) target bundleno = 48 (0x30), region = 24  ;;  %s291_s4 = sshll.u32 (!%p124_p3), %s569_s3, 3 }
  0x1b   : > { %s130_s5 = scalar_lea.sflag (!%p124_p3), [#allocation3], %s569_s3  ;;  %s133_s12 = scalar_lea.vmem (!%p124_p3), [#allocation2], %s291_s4 }
  0x1f   : > { %453 = dma.done.wait (%p542_p8), %s130_s5, 128  }
  0x20   : > { %455 = vsyncadd (%p542_p8), %s130_s5, 4294967168  ;;  %s292_s13 = sshll.u32 %s569_s3, 4  ;;  %v158_v0 = vlaneseq  ;;  %s306_s15 = sshll.u32 %s474_s9, 4  ;;  %v484_v1 = vmov 0.0  }
  0x21   : > { %s152_s16 = scalar_lea.vmem [#allocation5], %s292_s13  ;;  %s194_s23 = scalar_lea.hbm %s617_s1, %s306_s15  ;;  %v157_v2 = vld [vmem:[%s133_s12] ss:$4 sm:$0x3] }
  0x22   : > { %155 = vst [vmem:[%s152_s16] sm:$0xff] %v484_v1  ;;  %vm160_vm0 = vcmp.lt.s32.totalorder %v158_v0, 256  ;;  %s196_s24 = sshll.u32 %s152_s16, 4  ;;  %s198_s25 = sshll.u32 %s194_s23, 4  ;;  %v294_v3 = vld [vmem:[%s133_s12 + $0x1] ss:$4 sm:$0x3]  ;;  %s197_s24 = int_to_ptr.vmem [resolvable:$true] %s196_s24  ;;  %s199_s25 = int_to_ptr.hbm [resolvable:$true] %s198_s25 }
  0x23   : > { %156 = vst [vmem:[%s152_s16 + $0x8] sm:$0xff] %v484_v1  ;;  %v296_v4 = vld [vmem:[%s133_s12 + $0x2] ss:$4 sm:$0x3]  ;;  %s181_s9 = scalar_lea.sflag [#allocation4], %s569_s3  ;;  %s414_s18 = sshra.s32 %s199_s25, 4  ;;  %s415_s18 = int_to_ptr.hbm [resolvable:$true] %s414_s18 }
  0x24   : > { %293 = vst.msk [vmem:[%s152_s16 + $0x5] ss:$8 sm:$0x3] %vm160_vm0, %v157_v2  ;;  %v298_v5 = vld [vmem:[%s133_s12 + $0x3] ss:$4 sm:$0x3]  ;;  %p421_p7 = scmp.lt.s32.totalorder %s415_s18, %s617_s1 }
  0x25   : > { %295 = vst.msk [vmem:[%s152_s16 + $0x1] ss:$8 sm:$0x3] %vm160_vm0, %v294_v3  ;;  %s416_s26 = scalar_lea.hbm %s415_s18, 16  ;;  %s420_s29 = scalar_lea.hbm %s617_s1, 32 }
  0x26   : > { %297 = vst.msk [vmem:[%s152_s16 + $0x6] ss:$8 sm:$0x3] %vm160_vm0, %v296_v4  ;;  %p417_p4 = scmp.ne.s32.totalorder %s415_s18, %s416_s26  ;;  %p422_p8 = scmp.lt.s32.totalorder %s420_s29, %s416_s26 }
  0x27   : > { %299 = vst.msk [vmem:[%s152_s16 + $0x3] ss:$8 sm:$0x3] %vm160_vm0, %v298_v5 }
  0x28   : > { %p418_p5 = pnand %p417_p4, %p546_p9  ;;  %p423_p10 = por %p422_p8, %p421_p7 }
  0x2a   : > { %p419_p6 = pneg %p418_p5 }
  0x2c   : > { %p424_p13 = pnand %p423_p10, %p419_p6 }
  0x2e   : > { %427 = shalt.err (!%p424_p13)
}
  0x2f   : > { %309 = dma.vmem_to_hbm [thread:$0]  (%p546_p9), %s197_s24, 256, %s199_s25, %s181_s9  }
  0x30 PF: > { %s210_s3 = sand.u32 1, %s462_s6   ;;  %p316_p0 = pnand %p286_p12, %p553_p11 }
  0x31   : > { %s211_s4 = scalar_lea.sflag [#allocation4], %s210_s3 }
  0x32   : > { %p317_p1 = pneg %p316_p0 }
  0x34   : > { %457 = dma.done.wait (%p317_p1), %s211_s4, 256  }
  0x35   : > { %459 = vsyncadd (%p317_p1), %s211_s4, 4294967040  ;;  %s17_s11 = sadd.s32 1, %s482_s11   ;;  %s622_s6 = smov %s466_s7 }
  0x36   : > { %p14_p2 = scmp.ge.s32.totalorder %s17_s11, 4   ;;  %s623_s7 = smov %s470_s8 }
  0x37   : > { %s624_s8 = smov %s551_s20  ;;  %s625_s9 = smov %s478_s10 }
  0x38   : > { %s626_s10 = smov %s628_s14  ;;  %16 = sbr.rel (!%p14_p2) target bundleno = 6 (0x6), region = 76 }
  0x3d   :  { %217 = vsyncpa [#allocation3], 1 }
  0x3e   :  { %219 = vsyncpa [#allocation3 + $0x1], 1 }
  0x3f   :  { %220 = vsyncpa [#allocation4], 1 }
  0x40   :  { %222 = vsyncpa [#allocation4 + $0x1], 1 }

</bundles_post_ra>
